<compile_context>
chip_gen: v7x
topology: tpu7x:2x2x1
jax: 0.10.0
libtpu: 0.0.40
codegen_flags: <defaults>
</compile_context>

<pallas_src>
import functools

import jax
import jax.numpy as jnp
from jax import lax
from jax.experimental import pallas as pl
from jax.experimental.pallas import tpu as pltpu

LANE = 128


def _conv_bn_relu_kernel(H, KH, x_ref, b_ref, shift_ref, o_ref):
    """Fused 3x3 conv (stride 1) + folded-BN shift + ReLU, one image per step.

    x_ref:     (Hp, Wp*Cin)          bf16 padded input rows (128 lanes)
    b_ref:     (KH, Wp*Cin, W*Cout)  bf16 banded weight, BN scale folded in
    shift_ref: (1, W*Cout)           f32  BN shift, lane-dense
    o_ref:     (H, W*Cout)           f32  output rows, lane-dense
    """
    # KH accumulated MXU dots (one per vertical tap) into one f32 accumulator:
    # same MXU cycles as a single K=KH*Wp*Cin dot, but no lane-axis concat.
    # The ky row slices are static; if profiling ever shows them lowered as
    # VPU copies, express the shift with pltpu.roll(x_ref[...], Hp-ky, axis=0)
    # (XLU slot, otherwise idle here).
    acc = jnp.dot(x_ref[0:H, :], b_ref[0], preferred_element_type=jnp.float32)
    for ky in range(1, KH):
        acc = acc + jnp.dot(x_ref[ky:ky + H, :], b_ref[ky],
                            preferred_element_type=jnp.float32)

    # Folded-BN shift + ReLU epilogue, f32, full 128-lane width -> unmasked vst.
    o_ref[...] = jnp.maximum(acc + shift_ref[...], 0.0).astype(o_ref.dtype)


def fold_conv_bn_params(weight_oihw, gamma, beta, running_mean, running_var,
                        *, W, padding=1, eps=1e-5):
    """Pre-pack Conv+BN params. Call ONCE per weight update, not per forward.

    Returns:
      B:         (KH, Wp*Cin, W*Cout) bf16 banded (Toeplitz-over-width) weight
                 with the eval-mode BN scale folded in.
      shift_row: (1, W*Cout) f32 BN shift, tiled lane-dense.
      Wp:        padded width used for the activation layout (Wp*Cin % 128 == 0).
    """
    Cout, Cin, KH, KW = weight_oihw.shape
    assert LANE % Cin == 0, "input lane packing assumes Cin divides 128"
    assert (W * Cout) % LANE == 0, "output lane width must be a multiple of 128"
    Wp = pl.cdiv((W + 2 * padding) * Cin, LANE) * (LANE // Cin)
    assert W + KW - 1 <= Wp

    # Eval-mode BatchNorm folding.
    scale = gamma / jnp.sqrt(running_var + eps)          # (Cout,)
    shift = beta - running_mean * scale                  # (Cout,)

    # (KH, KW, Cin, Cout) with BN scale folded into the conv weights.
    w_hwio = jnp.transpose(weight_oihw, (2, 3, 1, 0)) * scale[None, None, None, :]

    # Banded weight: B[ky, wp*Cin + ci, w*Cout + co] = w_hwio[ky, wp-w, ci, co]
    # if 0 <= wp-w < KW else 0.  Columns wp >= W+KW-1 (the lane padding out to
    # Wp) stay zero, matching the zero-padded activation columns.
    B = jnp.zeros((KH, Wp, Cin, W, Cout), jnp.float32)
    w_idx = jnp.arange(W)
    for kx in range(KW):
        val = jnp.broadcast_to(w_hwio[:, kx, :, :][None], (W, KH, Cin, Cout))
        B = B.at[:, w_idx + kx, :, w_idx, :].set(val)
    B = B.reshape(KH, Wp * Cin, W * Cout).astype(jnp.bfloat16)

    shift_row = jnp.tile(shift, W).reshape(1, W * Cout).astype(jnp.float32)
    return B, shift_row, Wp


@functools.partial(jax.jit, static_argnames=("padding",))
def conv_bn_act_forward(x_nchw, B, shift_row, *, padding=1):
    """Forward of ConvBnActBlock (k=3, s=1, p=1, groups=1, dil=1, BN eval, ReLU).

    x_nchw: (N, Cin, H, W) float32; B/shift_row from fold_conv_bn_params.
    Returns (N, Cout, H, W).
    """
    N, Cin, H, W = x_nchw.shape
    KH, WpCin, WCout = B.shape
    Cout = WCout // W
    Wp = WpCin // Cin
    Hp = H + 2 * padding

    # --- layout glue (plain JAX) ---
    # TODO(synk): keep activations NHWC model-wide to drop these HBM passes.
    x = jnp.transpose(x_nchw, (0, 2, 3, 1))                        # NHWC
    x = jnp.pad(x, ((0, 0), (padding, padding),
                    (padding, Wp - W - padding), (0, 0)))          # pad H and W->Wp
    x3d = x.reshape(N, Hp, Wp * Cin).astype(jnp.bfloat16)

    kernel = functools.partial(_conv_bn_relu_kernel, H, KH)
    out = pl.pallas_call(
        kernel,
        out_shape=jax.ShapeDtypeStruct((N, H, WCout), jnp.float32),
        grid_spec=pltpu.PrefetchScalarGridSpec(
            num_scalar_prefetch=0,
            grid=(N,),                                   # one image per step
            in_specs=[
                pl.BlockSpec((None, Hp, WpCin), lambda n: (n, 0, 0)),
                pl.BlockSpec((KH, WpCin, WCout), lambda n: (0, 0, 0)),  # resident
                pl.BlockSpec((1, WCout), lambda n: (0, 0)),             # resident
            ],
            out_specs=pl.BlockSpec((None, H, WCout), lambda n: (n, 0, 0)),
        ),
        compiler_params=pltpu.CompilerParams(
            dimension_semantics=("parallel",)),
    )(x3d, B, shift_row)

    out = out.reshape(N, H, W, Cout)
    return jnp.transpose(out, (0, 3, 1, 2)).astype(x_nchw.dtype)


if __name__ == "__main__":
    # ConvBnActBlock(inplanes=4, planes=8, kernel_size=3, stride=1, padding=1,
    #                has_bn=True, has_act=True)
    N, Cin, H, W = 2, 4, 16, 16
    Cout, KH, KW = 8, 3, 3

    key = jax.random.PRNGKey(0)
    kx_, kw_, kg, kb, km, kv = jax.random.split(key, 6)

    x = jax.random.normal(kx_, (N, Cin, H, W), dtype=jnp.float32)
    weight = jax.random.normal(kw_, (Cout, Cin, KH, KW), dtype=jnp.float32) * 0.1
    gamma = 1.0 + 0.1 * jax.random.normal(kg, (Cout,), dtype=jnp.float32)
    beta = 0.1 * jax.random.normal(kb, (Cout,), dtype=jnp.float32)
    running_mean = 0.1 * jax.random.normal(km, (Cout,), dtype=jnp.float32)
    running_var = jnp.abs(1.0 + 0.1 * jax.random.normal(kv, (Cout,),
                                                        dtype=jnp.float32))

    # Weight repacking happens once per weight update, not per forward.
    B, shift_row, _ = fold_conv_bn_params(weight, gamma, beta, running_mean,
                                          running_var, W=W, padding=1)

    out = conv_bn_act_forward(x, B, shift_row, padding=1)
    jax.block_until_ready(out)
    assert out.shape == (N, Cout, H, W)

    eps = 1e-5
    scale = gamma / jnp.sqrt(running_var + eps)
    shift = beta - running_mean * scale

    # Tight check: reference with the same bf16-rounded operands the MXU sees.
    x_bf = x.astype(jnp.bfloat16).astype(jnp.float32)
    wf_bf = (weight * scale[:, None, None, None]).astype(jnp.bfloat16).astype(jnp.float32)
    ref = lax.conv_general_dilated(
        x_bf, wf_bf, window_strides=(1, 1), padding=((1, 1), (1, 1)),
        dimension_numbers=("NCHW", "OIHW", "NCHW"))
    ref = jnp.maximum(ref + shift.reshape(1, Cout, 1, 1), 0.0)
    assert jnp.max(jnp.abs(out - ref)) < 2e-3

    # Loose sanity check vs. full-precision module math (bf16 MXU inputs).
    ref32 = lax.conv_general_dilated(
        x, weight, window_strides=(1, 1), padding=((1, 1), (1, 1)),
        dimension_numbers=("NCHW", "OIHW", "NCHW"))
    ref32 = jnp.maximum(ref32 * scale.reshape(1, Cout, 1, 1)
                        + shift.reshape(1, Cout, 1, 1), 0.0)
    assert jnp.max(jnp.abs(out - ref32)) < 1e-1

    print("KERNEL_OK")
</pallas_src>

<mosaic_0001>
module attributes {stable_mosaic.version = 11 : i64} {
  func.func @_conv_bn_relu_kernel(%arg0: i32, %arg1: memref<1x18x128xbf16, #tpu.memory_space<vmem>>, %arg2: memref<3x128x128xbf16, #tpu.memory_space<vmem>>, %arg3: memref<1x128xf32, #tpu.memory_space<vmem>>, %arg4: memref<1x16x128xf32, #tpu.memory_space<vmem>>) attributes {dimension_semantics = [#tpu.dimension_semantics<parallel>], iteration_bounds = array<i64: 2>, scalar_prefetch = 0 : i64, scratch_operands = 0 : i64, tpu.core_type = #tpu.core_type<tc>, window_params = [{transform_indices = @transform_0, window_bounds = array<i64: 1, 18, 128>}, {pipeline_mode = #tpu.pipeline_mode<synchronous>, transform_indices = @transform_1, window_bounds = array<i64: 3, 128, 128>}, {pipeline_mode = #tpu.pipeline_mode<synchronous>, transform_indices = @transform_2, window_bounds = array<i64: 1, 128>}, {transform_indices = @transform_3, window_bounds = array<i64: 1, 16, 128>}]} {
    %c0 = arith.constant 0 : index
    %c0_0 = arith.constant 0 : index
    %c0_1 = arith.constant 0 : index
    %0 = vector.load %arg1[%c0, %c0_0, %c0_1] : memref<1x18x128xbf16, #tpu.memory_space<vmem>>, vector<1x16x128xbf16>
    %1 = vector.shape_cast %0 : vector<1x16x128xbf16> to vector<16x128xbf16>
    %c0_2 = arith.constant 0 : index
    %c0_3 = arith.constant 0 : index
    %c0_4 = arith.constant 0 : index
    %2 = vector.load %arg2[%c0_2, %c0_3, %c0_4] : memref<3x128x128xbf16, #tpu.memory_space<vmem>>, vector<1x128x128xbf16>
    %3 = vector.shape_cast %2 : vector<1x128x128xbf16> to vector<128x128xbf16>
    %cst = arith.constant dense<0.000000e+00> : vector<16x128xf32>
    %4 = tpu.matmul %1, %3, %cst {dimension_numbers = #tpu.dot_dimension_numbers<[1], [0], [0], [1], [0, 0, 1, 1], [], []>} : vector<16x128xbf16>, vector<128x128xbf16>, vector<16x128xf32> -> vector<16x128xf32>
    %c0_5 = arith.constant 0 : index
    %c1 = arith.constant 1 : index
    %c0_6 = arith.constant 0 : index
    %5 = vector.load %arg1[%c0_5, %c1, %c0_6] : memref<1x18x128xbf16, #tpu.memory_space<vmem>>, vector<1x16x128xbf16>
    %6 = vector.shape_cast %5 : vector<1x16x128xbf16> to vector<16x128xbf16>
    %c1_7 = arith.constant 1 : index
    %c0_8 = arith.constant 0 : index
    %c0_9 = arith.constant 0 : index
    %7 = vector.load %arg2[%c1_7, %c0_8, %c0_9] : memref<3x128x128xbf16, #tpu.memory_space<vmem>>, vector<1x128x128xbf16>
    %8 = vector.shape_cast %7 : vector<1x128x128xbf16> to vector<128x128xbf16>
    %cst_10 = arith.constant dense<0.000000e+00> : vector<16x128xf32>
    %9 = tpu.matmul %6, %8, %cst_10 {dimension_numbers = #tpu.dot_dimension_numbers<[1], [0], [0], [1], [0, 0, 1, 1], [], []>} : vector<16x128xbf16>, vector<128x128xbf16>, vector<16x128xf32> -> vector<16x128xf32>
    %10 = arith.addf %4, %9 : vector<16x128xf32>
    %c0_11 = arith.constant 0 : index
    %c2 = arith.constant 2 : index
    %c0_12 = arith.constant 0 : index
    %11 = vector.load %arg1[%c0_11, %c2, %c0_12] : memref<1x18x128xbf16, #tpu.memory_space<vmem>>, vector<1x16x128xbf16>
    %12 = vector.shape_cast %11 : vector<1x16x128xbf16> to vector<16x128xbf16>
    %c2_13 = arith.constant 2 : index
    %c0_14 = arith.constant 0 : index
    %c0_15 = arith.constant 0 : index
    %13 = vector.load %arg2[%c2_13, %c0_14, %c0_15] : memref<3x128x128xbf16, #tpu.memory_space<vmem>>, vector<1x128x128xbf16>
    %14 = vector.shape_cast %13 : vector<1x128x128xbf16> to vector<128x128xbf16>
    %cst_16 = arith.constant dense<0.000000e+00> : vector<16x128xf32>
    %15 = tpu.matmul %12, %14, %cst_16 {dimension_numbers = #tpu.dot_dimension_numbers<[1], [0], [0], [1], [0, 0, 1, 1], [], []>} : vector<16x128xbf16>, vector<128x128xbf16>, vector<16x128xf32> -> vector<16x128xf32>
    %16 = arith.addf %10, %15 : vector<16x128xf32>
    %c0_17 = arith.constant 0 : index
    %c0_18 = arith.constant 0 : index
    %17 = vector.load %arg3[%c0_17, %c0_18] : memref<1x128xf32, #tpu.memory_space<vmem>>, vector<1x128xf32>
    %18 = vector.broadcast %17 : vector<1x128xf32> to vector<16x128xf32>
    %19 = arith.addf %16, %18 : vector<16x128xf32>
    %cst_19 = arith.constant 0.000000e+00 : f32
    %20 = vector.broadcast %cst_19 : f32 to vector<16x128xf32>
    %21 = arith.maximumf %19, %20 : vector<16x128xf32>
    %c0_20 = arith.constant 0 : index
    %c0_21 = arith.constant 0 : index
    %c0_22 = arith.constant 0 : index
    %22 = vector.load %arg4[%c0_20, %c0_21, %c0_22] : memref<1x16x128xf32, #tpu.memory_space<vmem>>, vector<1x16x128xf32>
    %23 = vector.shape_cast %22 : vector<1x16x128xf32> to vector<16x128xf32>
    %24 = vector.shape_cast %21 : vector<16x128xf32> to vector<1x16x128xf32>
    tpu.vector_store %arg4[%c0_20, %c0_21, %c0_22], %24 {strides = array<i32>} : memref<1x16x128xf32, #tpu.memory_space<vmem>>, vector<1x16x128xf32>,
    return
  }
  func.func @transform_0(%arg0: i32) -> (i32, i32, i32) {
    %c0_i32 = arith.constant 0 : i32
    %c0_i32_0 = arith.constant 0 : i32
    %c0_i32_1 = arith.constant 0 : i32
    return %arg0, %c0_i32, %c0_i32_0 : i32, i32, i32
  }
  func.func @transform_1(%arg0: i32) -> (i32, i32, i32) {
    %c0_i32 = arith.constant 0 : i32
    %c0_i32_0 = arith.constant 0 : i32
    %c0_i32_1 = arith.constant 0 : i32
    %c0_i32_2 = arith.constant 0 : i32
    return %c0_i32, %c0_i32_0, %c0_i32_1 : i32, i32, i32
  }
  func.func @transform_2(%arg0: i32) -> (i32, i32) {
    %c0_i32 = arith.constant 0 : i32
    %c0_i32_0 = arith.constant 0 : i32
    %c0_i32_1 = arith.constant 0 : i32
    return %c0_i32, %c0_i32_0 : i32, i32
  }
  func.func @transform_3(%arg0: i32) -> (i32, i32, i32) {
    %c0_i32 = arith.constant 0 : i32
    %c0_i32_0 = arith.constant 0 : i32
    %c0_i32_1 = arith.constant 0 : i32
    return %arg0, %c0_i32, %c0_i32_0 : i32, i32, i32
  }
}

</mosaic_0001>

<bundles_post_ra>
// kernel: conv_bn_act_forward.1
= control target key start
LH: loop header
LB: loop body
LE: loop exit
PB: predicated region body
PF: predicated region fallthrough
CT: control target
= control target key end

     0   :  { %s820_s12 = smov 0   ;;  %s952_s0 = inlined_call_operand.vmem [shape: bf16[2,18,128], index: 0, kind: input, shape index: {}]   ;;  %s953_s1 = inlined_call_operand.vmem [shape: bf16[3,128,128], index: 1, kind: input, shape index: {}]   ;;  %s954_s2 = inlined_call_operand.vmem [shape: f32[1,128], index: 2, kind: input, shape index: {}]   ;;  %s955_s3 = inlined_call_operand.vmem [shape: f32[2,16,128], index: 3, kind: output, shape index: {}]  }
   0x1 LB: > { %s594_s13 = sadd.s32 4294967295, %s796_s12   ;;  %p598_p0 = scmp.ge.s32.totalorder %s796_s12, 1  ;;  %s796_s12 = sphi %s820_s12, %s13_s12  }
   0x2   : > { %p137_p1 = scmp.lt.s32.totalorder %s796_s12, 3 }
   0x4   : > { %p138_p2 = pnand %p598_p0, %p137_p1 }
   0x5   : > { %v763_v0 = vld [vmem:[%s953_s1 + $0x40] sm:$0xff] (!%p138_p2)   ;;  %v798_v1 = vmov (!%p138_p2), 0.0   ;;  %v765_v3 = vld [vmem:[%s953_s1 + $0x48] sm:$0xff] (!%p138_p2)   ;;  %vm799_vm0 = vmmov (!%p138_p2), 0   ;;  %p161_p3 = scmp.lt.s32.totalorder (!%p138_p2), %s594_s13, 1  ;;  %v767_v5 = vld [vmem:[%s953_s1 + $0x50] sm:$0xff] (!%p138_p2)  }
   0x6   : > { %141 = sbr.rel (%p138_p2) target bundleno = 291 (0x123), region = 32  ;;  %692 = vmatprep.subr.bf16.mxu0 (!%p138_p2), %v798_v1  ;;  %712 = vmatprep.subr.bf16.mxu1 (!%p138_p2), %v798_v1  ;;  %v764_v2 = vld [vmem:[%s953_s1] sm:$0xff] (!%p138_p2)   ;;  %v766_v4 = vld [vmem:[%s953_s1 + $0x8] sm:$0xff] (!%p138_p2)   ;;  %v768_v6 = vld [vmem:[%s953_s1 + $0x10] sm:$0xff] (!%p138_p2)   ;;  %vm216_vm1 = vsmask.f32 (!%p138_p2), 7424 }
   0x7   : > { %693 = vmatpush3.bf16.msra.mxu0 (!%p138_p2), %v763_v0  ;;  %708 = vmatprep.mubr.msk.bf16.mxu0 (!%p138_p2), %vm799_vm0, %v798_v1  ;;  %v769_v7 = vld [vmem:[%s953_s1 + $0x58] sm:$0xff] (!%p138_p2)   ;;  %v771_v9 = vld [vmem:[%s953_s1 + $0x60] sm:$0xff] (!%p138_p2)   ;;  %v773_v13 = vld [vmem:[%s953_s1 + $0x68] sm:$0xff] (!%p138_p2)   ;;  %vm430_vm2 = vcmask (!%p138_p2), 1046528  }
   0x8   : > { %713 = vmatpush3.bf16.msra.mxu1 (!%p138_p2), %v764_v2  ;;  %694 = vmatprep.subr.bf16.mxu0 (!%p138_p2), %v798_v1  ;;  %v770_v8 = vld [vmem:[%s953_s1 + $0x18] sm:$0xff] (!%p138_p2)   ;;  %v772_v10 = vld [vmem:[%s953_s1 + $0x20] sm:$0xff] (!%p138_p2)   ;;  %v774_v16 = vld [vmem:[%s953_s1 + $0x28] sm:$0xff] (!%p138_p2)  }
   0x9   : > { %714 = vmatprep.subr.bf16.mxu1 (!%p138_p2), %v798_v1  ;;  %728 = vmatprep.mubr.msk.bf16.mxu1 (!%p138_p2), %vm799_vm0, %v798_v1  ;;  %v775_v18 = vld [vmem:[%s953_s1 + $0x70] sm:$0xff] (!%p138_p2)   ;;  %v777_v23 = vld [vmem:[%s953_s1 + $0x78] sm:$0xff] (!%p138_p2)   ;;  %v781_v28 = vld [vmem:[%s953_s1 + $0x80] sm:$0xff] (!%p138_p2)  }
   0xa   : > { %v776_v22 = vld [vmem:[%s953_s1 + $0x30] sm:$0xff] (!%p138_p2)   ;;  %v778_v26 = vld [vmem:[%s953_s1 + $0x38] sm:$0xff] (!%p138_p2)   ;;  %v782_v29 = vld [vmem:[%s953_s1 + $0x88] sm:$0xff] (!%p138_p2)  }
   0xb   : > { %695 = vmatpush3.bf16.msra.mxu0 (!%p138_p2), %v765_v3  ;;  %v783_v30 = vld [vmem:[%s953_s1 + $0x90] sm:$0xff] (!%p138_p2)   ;;  %v784_v31 = vld [vmem:[%s953_s1 + $0x98] sm:$0xff] (!%p138_p2)   ;;  %v785_v32 = vld [vmem:[%s953_s1 + $0xa0] sm:$0xff] (!%p138_p2)  }
   0xc   : > { %715 = vmatpush3.bf16.msra.mxu1 (!%p138_p2), %v766_v4  ;;  %696 = vmatprep.subr.bf16.mxu0 (!%p138_p2), %v798_v1  ;;  %v786_v33 = vld [vmem:[%s953_s1 + $0xa8] sm:$0xff] (!%p138_p2)   ;;  %v787_v35 = vld [vmem:[%s953_s1 + $0xb0] sm:$0xff] (!%p138_p2)   ;;  %v788_v37 = vld [vmem:[%s953_s1 + $0xb8] sm:$0xff] (!%p138_p2)  }
   0xd   : > { %s957_s13 = smov (!%p161_p3, %s594_s13), 1  ;;  %716 = vmatprep.subr.bf16.mxu1 %v798_v1  ;;  %v661_v52 = vld [vmem:[%s954_s2] ss:$0 sm:$0xff] }
   0xe   : > { %s752_s26 = smul.u32 12, %s957_s13  ;;  %s664_s18 = sshll.u32 %s957_s13, 4 }
   0xf   : > { %697 = vmatpush3.bf16.msra.mxu0 %v767_v5  ;;  %s170_s21 = scalar_lea.vmem %s955_s3, %s664_s18 }
  0x10   : > { %717 = vmatpush3.bf16.msra.mxu1 %v768_v6  ;;  %698 = vmatprep.subr.bf16.mxu0 %v798_v1  ;;  %s870_s6 = scalar_lea.vmem %s952_s0, %s752_s26 }
  0x11   : > { %718 = vmatprep.subr.bf16.mxu1 %v798_v1  ;;  %v172_v11 = vld [vmem:[%s870_s6] sm:$0xf]  ;;  %v173_v12 = vld [vmem:[%s870_s6 + $0x4] sm:$0xf] }
  0x12   : > { %v618_v14 = vcombine.low %v172_v11, %v173_v12  ;;  %v780_v15 = vld [vmem:[%s870_s6 + $0x8] ss:$0 sps:$4 sm:$0x11]   ;;  %v409_v34 = vld [vmem:[%s870_s6] sm:$0xe] }
  0x13   : > { %699 = vmatpush3.bf16.msra.mxu0 %v769_v7  ;;  %v225_v21 = vshll.u32 %v780_v15, 16  ;;  %v652_v36 = vcombine.low %v409_v34, %v173_v12  ;;  %v432_v39 = vrot.slane %v780_v15, 1 }
  0x14   : > { %719 = vmatpush3.bf16.msra.mxu1 %v770_v8  ;;  %700 = vmatprep.subr.bf16.mxu0 %v798_v1  ;;  %v220_v17 = vshll.u32 %v618_v14, 16  ;;  %v218_v19 = vshrl.u32 %v618_v14, 16 }
  0x15   : > { %720 = vmatprep.subr.bf16.mxu1 %v798_v1  ;;  %v227_v25 = vrot.slane %v225_v21, 1  ;;  %v431_v38 = vrot.slane %v652_v36, 1 }
  0x16   : > { %v222_v20 = vrot.slane %v220_v17, 1 }
  0x17   : > { %701 = vmatpush3.bf16.msra.mxu0 %v771_v9  ;;  %v433_v40 = vsel %vm430_vm2, %v431_v38, %v432_v39 }
  0x18   : > { %721 = vmatpush3.bf16.msra.mxu1 %v772_v10  ;;  %702 = vmatprep.subr.bf16.mxu0 %v798_v1  ;;  %v223_v24 = vor.u32 %v222_v20, %v218_v19 }
  0x19   : > { %722 = vmatprep.subr.bf16.mxu1 %v798_v1 }
  0x1a   : > { %v228_v27 = vsel %vm216_vm1, %v223_v24, %v227_v25 }
  0x1b   : > { %703 = vmatpush3.bf16.msra.mxu0 %v773_v13 }
  0x1c   : > { %723 = vmatpush3.bf16.msra.mxu1 %v774_v16  ;;  %704 = vmatprep.subr.bf16.mxu0 %v798_v1 }
  0x1d   : > { %724 = vmatprep.subr.bf16.mxu1 %v798_v1 }
  0x1f   : > { %705 = vmatpush3.bf16.msra.mxu0 %v775_v18 }
  0x20   : > { %725 = vmatpush3.bf16.msra.mxu1 %v776_v22  ;;  %706 = vmatprep.subr.bf16.mxu0 %v798_v1 }
  0x21   : > { %726 = vmatprep.subr.bf16.mxu1 %v798_v1 }
  0x23   : > { %707 = vmatpush3.bf16.msra.mxu0 %v777_v23 }
  0x24   : > { %727 = vmatpush3.bf16.msra.mxu1 %v778_v26  ;;  %732 = vmatprep.subr.bf16.mxu0 %v798_v1 }
  0x26   : > { %709 = vmatmul.mubr.bf16.vlgmr.msra.gmra.mrb[0].mxu0 %v228_v27 }
  0x27   : > { %729 = vmatmul.mubr.bf16.vlgmr.msra.gmra.mrb[0].mxu1 %v618_v14  ;;  %733 = vmatpush3.bf16.msra.mxu0 %v781_v28 }
  0x28   : > { %734 = vmatprep.subr.bf16.mxu0 %v798_v1  ;;  %748 = vmatprep.mubr.msk.bf16.mxu0 %vm799_vm0, %v798_v1 }
  0x2b   : > { %735 = vmatpush3.bf16.msra.mxu0 %v782_v29 }
  0x2c   : > { %736 = vmatprep.subr.bf16.mxu0 %v798_v1 }
  0x2f   : > { %737 = vmatpush3.bf16.msra.mxu0 %v783_v30 }
  0x30   : > { %738 = vmatprep.subr.bf16.mxu0 %v798_v1 }
  0x33   : > { %739 = vmatpush3.bf16.msra.mxu0 %v784_v31 }
  0x34   : > { %740 = vmatprep.subr.bf16.mxu0 %v798_v1 }
  0x37   : > { %741 = vmatpush3.bf16.msra.mxu0 %v785_v32 }
  0x38   : > { %742 = vmatprep.subr.bf16.mxu0 %v798_v1 }
  0x3b   : > { %743 = vmatpush3.bf16.msra.mxu0 %v786_v33 }
  0x3c   : > { %744 = vmatprep.subr.bf16.mxu0 %v798_v1 }
  0x3f   : > { %745 = vmatpush3.bf16.msra.mxu0 %v787_v35 }
  0x40   : > { %746 = vmatprep.subr.bf16.mxu0 %v798_v1 }
  0x43   : > { %747 = vmatpush3.bf16.msra.mxu0 %v788_v37 }
  0x46   : > { %749 = vmatmul.mubr.bf16.vlgmr.msra.gmra.mrb[4].mxu0 %v433_v40 }
  0xf9   : > { %v312_v41 = vpop.f32.mrb[0].mxu0 }
  0xfa   : > { %v402_v42 = vpop.f32.mrb[0].mxu1  ;;  %v710_v43 = vpop.f32.mrb[1].mxu0 }
  0xfb   : > { %v403_v44 = vadd.f32 %v402_v42, %v312_v41  ;;  %v730_v45 = vpop.f32.mrb[1].mxu1  ;;  %v315_v46 = vpop.f32.mrb[2].mxu0 }
  0xfc   : > { %v405_v47 = vpop.f32.mrb[2].mxu1  ;;  %v711_v48 = vpop.f32.mrb[3].mxu0 }
  0xfd   : > { %v406_v49 = vadd.f32 %v405_v47, %v315_v46  ;;  %v731_v50 = vpop.f32.mrb[3].mxu1 }
 0x119   : > { %v517_v51 = vpop.f32.mrb[4].mxu0 }
 0x11a   : > { %v524_v53 = vadd.f32 %v517_v51, %v403_v44  ;;  %v750_v54 = vpop.f32.mrb[5].mxu0 }
 0x11b   : > { %v520_v55 = vpop.f32.mrb[6].mxu0 }
 0x11c   : > { %v533_v56 = vadd.f32 %v661_v52, %v524_v53  ;;  %v525_v57 = vadd.f32 %v520_v55, %v406_v49  ;;  %v751_v58 = vpop.f32.mrb[7].mxu0 }
 0x11e   : > { %v535_v59 = vmax.f32 %v533_v56, 0.0  ;;  %v534_v60 = vadd.f32 %v661_v52, %v525_v57 }
 0x120   : > { %537 = vst [vmem:[%s170_s21] sm:$0xff] %v535_v59  ;;  %v536_v61 = vmax.f32 %v534_v60, 0.0 }
 0x122   : > { %538 = vst [vmem:[%s170_s21 + $0x8] sm:$0xff] %v536_v61 }
 0x123 PF: > { %s13_s12 = sadd.s32 1, %s796_s12  }
 0x124   : > { %p10_p4 = scmp.ge.s32.totalorder %s13_s12, 4  }
 0x126   :  { %12 = sbr.rel (!%p10_p4) target bundleno = 1 (0x1), region = 64 }

</bundles_post_ra>
